<compile_context>
chip_gen: v7x
topology: tpu7x:2x2x1
jax: 0.10.0
libtpu: 0.0.40
codegen_flags: <defaults>
</compile_context>

<pallas_src>
import math

import jax
import jax.numpy as jnp
from jax import lax
from jax.experimental import pallas as pl
from jax.experimental.pallas import tpu as pltpu

LANES = 128
MAX_TILE_ROWS = 4096   # (4096, 128) f32 = 2 MiB/block; 2 inputs x 2 buffers = 8 MiB VMEM
NCORES = 2             # "parallel" grid axis: both TensorCores on v7x, harmless elsewhere


def _make_kernel(alpha, tile_rows, acc_rows, steps_per_core):
    inv_alpha = 1.0 / (alpha + 0.0001)      # precomputed reciprocal: mul, not div
    block_elems = tile_rows * LANES

    def kernel(n_ref, pred_ref, true_ref, out_ref, acc_ref):
        c = pl.program_id(0)                # parallel axis (core on v7x)
        j = pl.program_id(1)                # arbitrary streaming axis

        @pl.when(j == 0)
        def _():
            acc_ref[...] = jnp.zeros_like(acc_ref)

        x = pred_ref[...].astype(jnp.float32)
        y = true_ref[...].astype(jnp.float32)

        # Shared transcendental: e = exp(-|x|)
        e = jnp.exp(-jnp.abs(x))

        # Numerically-stable BCE with logits (reduction='none'):
        #   loss = max(x, 0) - x*y + log(1 + exp(-|x|))
        loss = jnp.maximum(x, 0.0) - x * y + jnp.log1p(e)

        # sigmoid(x) rebuilt from e:  x>=0 -> 1/(1+e),  x<0 -> e/(1+e)
        # (exact divide kept: approx reciprocal error would be amplified ~20x
        #  inside exp((dx-1)*inv_alpha))
        inv = 1.0 / (1.0 + e)
        p = jnp.where(x >= 0.0, inv, e * inv)

        dx = p - y
        alpha_factor = 1.0 - jnp.exp((dx - 1.0) * inv_alpha)
        loss = loss * alpha_factor

        # Several independent accumulator vreg-rows: VPU adds only, no single
        # serial add chain; the one cross-lane reduce happens in the wrapper.
        def accumulate(v):
            acc_ref[...] += v.reshape(tile_rows // acc_rows, acc_rows, LANES).sum(axis=0)

        # Tail handling via scalar prefetch: only the last (partial) logical
        # block (and any fully-masked overflow step) pays for the mask.
        blk = c * steps_per_core + j
        rem = n_ref[0] - blk * block_elems  # elements still valid in this block

        @pl.when(rem >= block_elems)
        def _():
            accumulate(loss)

        @pl.when(rem < block_elems)
        def _():
            ri = lax.broadcasted_iota(jnp.int32, (tile_rows, LANES), 0)
            ci = lax.broadcasted_iota(jnp.int32, (tile_rows, LANES), 1)
            idx = ri * LANES + ci
            accumulate(jnp.where(idx < rem, loss, 0.0))

        # Each core dumps its lane-dense partial-sum slab once, at its last step.
        @pl.when(j == pl.num_programs(1) - 1)
        def _():
            out_ref[0] = acc_ref[...]

    return kernel


def bce_blur_with_logits_loss(pred, true, alpha=0.05):
    """Pallas implementation of BCEBlurWithLogitsLoss.forward (scalar mean)."""
    assert pred.shape == true.shape
    n_valid = int(math.prod(pred.shape))
    assert 0 < n_valid < 2**31  # int32 index math in-kernel

    pred_flat = jnp.ravel(pred)
    true_flat = jnp.ravel(true)

    rows = -(-n_valid // LANES)             # cdiv
    pad = rows * LANES - n_valid
    if pad:
        # Only for lane-ragged element counts (< 128 pad elements; values are
        # irrelevant because the kernel masks the tail by index).
        # TODO(synk): a 1-D blocked kernel would avoid this single HBM copy for
        # huge lane-ragged inputs.
        pred_flat = jnp.pad(pred_flat, (0, pad))
        true_flat = jnp.pad(true_flat, (0, pad))

    pred2d = pred_flat.reshape(rows, LANES)
    true2d = true_flat.reshape(rows, LANES)

    # Tile: one full-array block for small inputs; 2 MiB streaming blocks
    # (double-buffered: 8 MiB total, fits default scoped VMEM on v5e/v6e/v7x).
    tile_rows = rows if rows <= MAX_TILE_ROWS else MAX_TILE_ROWS
    if tile_rows % 64 == 0:
        acc_rows = 64
    elif tile_rows % 8 == 0:
        acc_rows = 8
    else:
        acc_rows = tile_rows                # tiny full-array block case

    n_blocks = -(-rows // tile_rows)        # real data blocks
    steps_per_core = -(-n_blocks // NCORES) # "arbitrary" axis length per core

    def in_map(c, j, n_ref):
        blk = c * steps_per_core + j
        # Clamp so a (fully masked) overflow step re-reads the last real block
        # instead of issuing an entirely out-of-bounds DMA.
        return (jnp.minimum(blk, n_blocks - 1), 0)

    out = pl.pallas_call(
        _make_kernel(alpha, tile_rows, acc_rows, steps_per_core),
        out_shape=jax.ShapeDtypeStruct((NCORES, acc_rows, LANES), jnp.float32),
        grid_spec=pltpu.PrefetchScalarGridSpec(
            num_scalar_prefetch=1,
            grid=(NCORES, steps_per_core),
            in_specs=[
                pl.BlockSpec((tile_rows, LANES), in_map),
                pl.BlockSpec((tile_rows, LANES), in_map),
            ],
            out_specs=pl.BlockSpec((1, acc_rows, LANES), lambda c, j, n_ref: (c, 0, 0)),
            scratch_shapes=[pltpu.VMEM((acc_rows, LANES), jnp.float32)],
        ),
        compiler_params=pltpu.CompilerParams(
            dimension_semantics=("parallel", "arbitrary"),
        ),
    )(jnp.array([n_valid], dtype=jnp.int32), pred2d, true2d)

    # Tiny final reduce over the (NCORES, acc_rows, 128) partial slabs; mean
    # over the ORIGINAL element count (masked padding contributes exactly 0).
    return jnp.sum(out) / jnp.float32(n_valid)


def _reference(pred, true, alpha=0.05):
    x = pred.astype(jnp.float32)
    y = true.astype(jnp.float32)
    loss = jnp.maximum(x, 0.0) - x * y + jnp.log1p(jnp.exp(-jnp.abs(x)))
    p = jax.nn.sigmoid(x)
    dx = p - y
    alpha_factor = 1.0 - jnp.exp((dx - 1.0) / (alpha + 0.0001))
    return jnp.mean(loss * alpha_factor)


if __name__ == "__main__":
    key = jax.random.PRNGKey(0)
    k1, k2, k3, k4 = jax.random.split(key, 4)

    # NCHW-style small shapes: batch=2, channels=4, spatial=16x16 (lane-aligned)
    pred = jax.random.normal(k1, (2, 4, 16, 16), dtype=jnp.float32)
    true = (jax.random.uniform(k2, (2, 4, 16, 16)) > 0.5).astype(jnp.float32)
    out = jax.block_until_ready(bce_blur_with_logits_loss(pred, true, alpha=0.05))
    ref = _reference(pred, true, alpha=0.05)
    assert jnp.allclose(out, ref, rtol=1e-5, atol=1e-6), (out, ref)

    # Lane-ragged shape to exercise the in-kernel tail masking path.
    pred_r = jax.random.normal(k3, (2, 3, 7, 11), dtype=jnp.float32)
    true_r = (jax.random.uniform(k4, (2, 3, 7, 11)) > 0.5).astype(jnp.float32)
    out_r = jax.block_until_ready(bce_blur_with_logits_loss(pred_r, true_r, alpha=0.05))
    ref_r = _reference(pred_r, true_r, alpha=0.05)
    assert jnp.allclose(out_r, ref_r, rtol=1e-5, atol=1e-6), (out_r, ref_r)

    print("KERNEL_OK")
</pallas_src>

<mosaic_0001>
module attributes {stable_mosaic.version = 11 : i64} {
  func.func @kernel(%arg0: i32, %arg1: i32, %arg2: memref<1xi32, #tpu.memory_space<smem>>, %arg3: memref<16x128xf32, #tpu.memory_space<vmem>>, %arg4: memref<16x128xf32, #tpu.memory_space<vmem>>, %arg5: memref<1x8x128xf32, #tpu.memory_space<vmem>>, %arg6: memref<8x128xf32, #tpu.memory_space<vmem>>) attributes {dimension_semantics = [#tpu.dimension_semantics<parallel>, #tpu.dimension_semantics<arbitrary>], iteration_bounds = array<i64: 2, 1>, scalar_prefetch = 1 : i64, scratch_operands = 1 : i64, tpu.core_type = #tpu.core_type<tc>, window_params = [{transform_indices = @transform_0, window_bounds = array<i64: 16, 128>}, {transform_indices = @transform_1, window_bounds = array<i64: 16, 128>}, {transform_indices = @transform_2, window_bounds = array<i64: 1, 8, 128>}]} {
    %c0_i32 = arith.constant 0 : i32
    %0 = arith.cmpi eq, %arg1, %c0_i32 : i32
    %1 = arith.extui %0 : i1 to i32
    %c0_i32_0 = arith.constant 0 : i32
    %2 = arith.cmpi ne, %1, %c0_i32_0 : i32
    scf.if %2 {
      %cst_18 = arith.constant 0.000000e+00 : f32
      %46 = vector.broadcast %cst_18 : f32 to vector<8x128xf32>
      %c0_19 = arith.constant 0 : index
      %c0_20 = arith.constant 0 : index
      %47 = vector.load %arg6[%c0_19, %c0_20] : memref<8x128xf32, #tpu.memory_space<vmem>>, vector<8x128xf32>
      tpu.vector_store %arg6[%c0_19, %c0_20], %46 {strides = array<i32>} : memref<8x128xf32, #tpu.memory_space<vmem>>, vector<8x128xf32>,
    } else {
    }
    %c0 = arith.constant 0 : index
    %c0_1 = arith.constant 0 : index
    %3 = vector.load %arg3[%c0, %c0_1] : memref<16x128xf32, #tpu.memory_space<vmem>>, vector<16x128xf32>
    %c0_2 = arith.constant 0 : index
    %c0_3 = arith.constant 0 : index
    %4 = vector.load %arg4[%c0_2, %c0_3] : memref<16x128xf32, #tpu.memory_space<vmem>>, vector<16x128xf32>
    %5 = math.absf %3 : vector<16x128xf32>
    %cst = arith.constant 0.000000e+00 : f32
    %6 = vector.broadcast %cst : f32 to vector<16x128xf32>
    %7 = arith.subf %6, %5 : vector<16x128xf32>
    %8 = math.exp %7 : vector<16x128xf32>
    %cst_4 = arith.constant 0.000000e+00 : f32
    %9 = vector.broadcast %cst_4 : f32 to vector<16x128xf32>
    %10 = arith.maximumf %3, %9 : vector<16x128xf32>
    %11 = arith.mulf %3, %4 : vector<16x128xf32>
    %12 = arith.subf %10, %11 : vector<16x128xf32>
    %13 = math.log1p %8 : vector<16x128xf32>
    %14 = arith.addf %12, %13 : vector<16x128xf32>
    %cst_5 = arith.constant 1.000000e+00 : f32
    %15 = vector.broadcast %cst_5 : f32 to vector<16x128xf32>
    %16 = arith.addf %15, %8 : vector<16x128xf32>
    %cst_6 = arith.constant 1.000000e+00 : f32
    %17 = vector.broadcast %cst_6 : f32 to vector<16x128xf32>
    %18 = arith.divf %17, %16 : vector<16x128xf32>
    %cst_7 = arith.constant 0.000000e+00 : f32
    %19 = vector.broadcast %cst_7 : f32 to vector<16x128xf32>
    %20 = arith.cmpf oge, %3, %19 : vector<16x128xf32>
    %21 = arith.mulf %8, %18 : vector<16x128xf32>
    %22 = arith.select %20, %18, %21 : vector<16x128xi1>, vector<16x128xf32>
    %23 = arith.subf %22, %4 : vector<16x128xf32>
    %cst_8 = arith.constant 1.000000e+00 : f32
    %24 = vector.broadcast %cst_8 : f32 to vector<16x128xf32>
    %25 = arith.subf %23, %24 : vector<16x128xf32>
    %cst_9 = arith.constant 19.9600792 : f32
    %26 = vector.broadcast %cst_9 : f32 to vector<16x128xf32>
    %27 = arith.mulf %25, %26 : vector<16x128xf32>
    %28 = math.exp %27 : vector<16x128xf32>
    %cst_10 = arith.constant 1.000000e+00 : f32
    %29 = vector.broadcast %cst_10 : f32 to vector<16x128xf32>
    %30 = arith.subf %29, %28 : vector<16x128xf32>
    %31 = arith.mulf %14, %30 : vector<16x128xf32>
    %c1_i32 = arith.constant 1 : i32
    %32 = arith.muli %arg0, %c1_i32 : i32
    %33 = arith.addi %32, %arg1 : i32
    %c0_11 = arith.constant 0 : index
    %34 = memref.load %arg2[%c0_11] : memref<1xi32, #tpu.memory_space<smem>>
    %c2048_i32 = arith.constant 2048 : i32
    %35 = arith.muli %33, %c2048_i32 : i32
    %36 = arith.subi %34, %35 : i32
    %c2048_i32_12 = arith.constant 2048 : i32
    %37 = arith.cmpi sge, %36, %c2048_i32_12 : i32
    %38 = arith.extui %37 : i1 to i32
    %c0_i32_13 = arith.constant 0 : i32
    %39 = arith.cmpi ne, %38, %c0_i32_13 : i32
    scf.if %39 {
      %c0_18 = arith.constant 0 : index
      %c0_19 = arith.constant 0 : index
      %46 = vector.load %arg6[%c0_18, %c0_19] : memref<8x128xf32, #tpu.memory_space<vmem>>, vector<8x128xf32>
      %47 = vector.shape_cast %31 : vector<16x128xf32> to vector<2x8x128xf32>
      %cst_20 = arith.constant dense<0.000000e+00> : vector<8x128xf32>
      %48 = vector.multi_reduction <add>, %47, %cst_20 [0] : vector<2x8x128xf32> to vector<8x128xf32>
      %49 = arith.addf %46, %48 : vector<8x128xf32>
      %c0_21 = arith.constant 0 : index
      %c0_22 = arith.constant 0 : index
      %50 = vector.load %arg6[%c0_21, %c0_22] : memref<8x128xf32, #tpu.memory_space<vmem>>, vector<8x128xf32>
      tpu.vector_store %arg6[%c0_21, %c0_22], %49 {strides = array<i32>} : memref<8x128xf32, #tpu.memory_space<vmem>>, vector<8x128xf32>,
    } else {
    }
    %c2048_i32_14 = arith.constant 2048 : i32
    %40 = arith.cmpi slt, %36, %c2048_i32_14 : i32
    %41 = arith.extui %40 : i1 to i32
    %c0_i32_15 = arith.constant 0 : i32
    %42 = arith.cmpi ne, %41, %c0_i32_15 : i32
    scf.if %42 {
      %46 = tpu.iota {dimensions = array<i32: 0>} : vector<16x128xi32>
      %47 = tpu.iota {dimensions = array<i32: 1>} : vector<16x128xi32>
      %c128_i32 = arith.constant 128 : i32
      %48 = vector.broadcast %c128_i32 : i32 to vector<16x128xi32>
      %49 = arith.muli %46, %48 : vector<16x128xi32>
      %50 = arith.addi %49, %47 : vector<16x128xi32>
      %51 = vector.broadcast %36 : i32 to vector<16x128xi32>
      %52 = arith.cmpi slt, %50, %51 : vector<16x128xi32>
      %cst_18 = arith.constant 0.000000e+00 : f32
      %53 = vector.broadcast %cst_18 : f32 to vector<16x128xf32>
      %54 = arith.select %52, %31, %53 : vector<16x128xi1>, vector<16x128xf32>
      %c0_19 = arith.constant 0 : index
      %c0_20 = arith.constant 0 : index
      %55 = vector.load %arg6[%c0_19, %c0_20] : memref<8x128xf32, #tpu.memory_space<vmem>>, vector<8x128xf32>
      %56 = vector.shape_cast %54 : vector<16x128xf32> to vector<2x8x128xf32>
      %cst_21 = arith.constant dense<0.000000e+00> : vector<8x128xf32>
      %57 = vector.multi_reduction <add>, %56, %cst_21 [0] : vector<2x8x128xf32> to vector<8x128xf32>
      %58 = arith.addf %55, %57 : vector<8x128xf32>
      %c0_22 = arith.constant 0 : index
      %c0_23 = arith.constant 0 : index
      %59 = vector.load %arg6[%c0_22, %c0_23] : memref<8x128xf32, #tpu.memory_space<vmem>>, vector<8x128xf32>
      tpu.vector_store %arg6[%c0_22, %c0_23], %58 {strides = array<i32>} : memref<8x128xf32, #tpu.memory_space<vmem>>, vector<8x128xf32>,
    } else {
    }
    %c0_i32_16 = arith.constant 0 : i32
    %43 = arith.cmpi eq, %arg1, %c0_i32_16 : i32
    %44 = arith.extui %43 : i1 to i32
    %c0_i32_17 = arith.constant 0 : i32
    %45 = arith.cmpi ne, %44, %c0_i32_17 : i32
    scf.if %45 {
      %c0_18 = arith.constant 0 : index
      %c0_19 = arith.constant 0 : index
      %46 = vector.load %arg6[%c0_18, %c0_19] : memref<8x128xf32, #tpu.memory_space<vmem>>, vector<8x128xf32>
      %c0_20 = arith.constant 0 : index
      %c0_21 = arith.constant 0 : index
      %c0_22 = arith.constant 0 : index
      %47 = vector.load %arg5[%c0_20, %c0_21, %c0_22] : memref<1x8x128xf32, #tpu.memory_space<vmem>>, vector<1x8x128xf32>
      %48 = vector.shape_cast %47 : vector<1x8x128xf32> to vector<8x128xf32>
      %49 = vector.shape_cast %46 : vector<8x128xf32> to vector<1x8x128xf32>
      tpu.vector_store %arg5[%c0_20, %c0_21, %c0_22], %49 {strides = array<i32>} : memref<1x8x128xf32, #tpu.memory_space<vmem>>, vector<1x8x128xf32>,
    } else {
    }
    return
  }
  func.func @transform_0(%arg0: i32, %arg1: i32, %arg2: memref<1xi32, #tpu.memory_space<smem>>) -> (i32, i32) {
    %c1_i32 = arith.constant 1 : i32
    %0 = arith.muli %arg0, %c1_i32 : i32
    %1 = arith.addi %0, %arg1 : i32
    %c0_i32 = arith.constant 0 : i32
    %2 = arith.minsi %1, %c0_i32 : i32
    %c0_i32_0 = arith.constant 0 : i32
    %c0_i32_1 = arith.constant 0 : i32
    return %2, %c0_i32_0 : i32, i32
  }
  func.func @transform_1(%arg0: i32, %arg1: i32, %arg2: memref<1xi32, #tpu.memory_space<smem>>) -> (i32, i32) {
    %c1_i32 = arith.constant 1 : i32
    %0 = arith.muli %arg0, %c1_i32 : i32
    %1 = arith.addi %0, %arg1 : i32
    %c0_i32 = arith.constant 0 : i32
    %2 = arith.minsi %1, %c0_i32 : i32
    %c0_i32_0 = arith.constant 0 : i32
    %c0_i32_1 = arith.constant 0 : i32
    return %2, %c0_i32_0 : i32, i32
  }
  func.func @transform_2(%arg0: i32, %arg1: i32, %arg2: memref<1xi32, #tpu.memory_space<smem>>) -> (i32, i32, i32) {
    %c0_i32 = arith.constant 0 : i32
    %c0_i32_0 = arith.constant 0 : i32
    %c0_i32_1 = arith.constant 0 : i32
    return %arg0, %c0_i32, %c0_i32_0 : i32, i32, i32
  }
}

</mosaic_0001>

<bundles_post_ra>
// kernel: tpu_custom_call.1
= control target key start
LH: loop header
LB: loop body
LE: loop exit
PB: predicated region body
PF: predicated region fallthrough
CT: control target
= control target key end

     0   :  { %s1016_s0 = inlined_call_operand.<no memory space> [shape: s32[1], index: 0, kind: input, shape index: {}]   ;;  %s1017_s1 = inlined_call_operand.hbm [shape: f32[16,128], index: 1, kind: input, shape index: {}]   ;;  %s1018_s2 = inlined_call_operand.hbm [shape: f32[16,128], index: 2, kind: input, shape index: {}]   ;;  %s1019_s3 = inlined_call_operand.hbm [shape: f32[2,8,128], index: 3, kind: output, shape index: {}]  }
   0x1   :  { %8 = sst [smem:[#allocation4]] %s1016_s0 }
   0x2   :  { %9 = vsyncpa [#allocation6], 0 }
   0x3   :  { %11 = vsyncpa [#allocation6 + $0x1], 0 }
   0x4   :  { %12 = vsyncpa [#allocation9], 0 }
   0x5   :  { %14 = vsyncpa [#allocation9 + $0x1], 0 }
   0x6   :  { %15 = vsyncpa [#allocation7], 0 }
   0x7   :  { %17 = vsyncpa [#allocation7 + $0x1], 0  ;;  %s798_s14 = smov 0   ;;  %s800_s15 = smov 0  }
   0x8   :  { %s802_s16 = smov 0   ;;  %s804_s17 = smov 0  }
   0x9   :  { %s806_s18 = smov 0   ;;  %s808_s19 = smov 0  }
   0xa   :  { %s810_s20 = smov 0   ;;  %s812_s0 = smov 0  }
   0xb LB: > { %s465_s21 = sadd.s32 4294967295, %s767_s0   ;;  %s466_s22 = sadd.s32 4294967294, %s767_s0   ;;  %s767_s0 = sphi %s812_s0, %s23_s0   ;;  %s763_s20 = sphi %s810_s20, %s1038_s20   ;;  %s759_s19 = sphi %s808_s19, %s1037_s19   ;;  %s755_s18 = sphi %s806_s18, %s1006_s18   ;;  %s751_s17 = sphi %s804_s17, %s1036_s17   ;;  %s747_s16 = sphi %s802_s16, %s1035_s16   ;;  %s743_s15 = sphi %s800_s15, %s1034_s15   ;;  %s739_s14 = sphi %s798_s14, %s1033_s14  }
   0xc   : > { %s35_s23 = sadd.s32 1, %s763_s20  ;;  %p736_p1 = scmp.ne.s32.totalorder %s755_s18, 0 }
   0xd   : > { %p37_p0 = scmp.ge.s32.totalorder %s35_s23, 2  ;;  %p56_p2 = scmp.eq.s32.totalorder %s767_s0, 0 }
   0xe   : > { %p61_p3 = scmp.ne.s32.totalorder %s755_s18, %s751_s17  ;;  %p62_p5 = scmp.eq.s32.totalorder %s465_s21, 0 }
   0xf   : > { %s1040_s23 = smov (%p37_p0, %s35_s23), 0  ;;  %p844_p4 = por %p736_p1, %p56_p2 }
  0x10   : > { %p848_p6 = por %p62_p5, %p61_p3  ;;  %s103_s26 = ssub.s32 %s763_s20, %s1040_s23 }
  0x11   : > { %p104_p7 = scmp.eq.s32.totalorder %s103_s26, 0  ;;  %s106_s27 = sadd.s32 1, %s747_s16 }
  0x12   : > { %s1023_s25 = scalar_select %p848_p6, 1, 0 }
  0x13   : > { %s856_s28 = scalar_select %p104_p7, %s747_s16, %s106_s27  }
  0x14   : > { %p116_p8 = scmp.ne.s32.totalorder %s747_s16, %s743_s15  ;;  %p117_p9 = scmp.eq.s32.totalorder %s465_s21, 1 }
  0x15   : > { %p122_p10 = scmp.ne.s32.totalorder %s743_s15, %s739_s14  ;;  %p123_p11 = scmp.eq.s32.totalorder %s466_s22, 1 }
  0x16   : > { %p862_p12 = por %p117_p9, %p116_p8  ;;  %p507_p1 = scmp.lt.s32.totalorder %s767_s0, 2 }
  0x17   : > { %p867_p0 = por %p123_p11, %p122_p10  ;;  %s769_s4 = smov [#allocation5]  }
  0x18   : > { %s1024_s29 = scalar_select %p862_p12, 1, 0 }
  0x19   : > { %s1025_s30 = scalar_select %p867_p0, 1, 0 }
  0x1a   : > { %s157_s5 = sshll.u32 %s769_s4, 4  ;;  %p874_p2 = pnand %p507_p1, %p844_p4  ;;  %s158_s5 = int_to_ptr.vmem [resolvable:$true] %s157_s5 }
  0x1b   : > { %s600_s9 = scalar_lea.hbm %s1017_s1, 256 }
  0x1c   : > { %p601_p3 = scmp.ne.s32.totalorder %s1017_s1, %s600_s9  ;;  %p602_p5 = pneg %p874_p2 }
  0x1d   : > { %p607_p8 = scmp.lt.u32.totalorder %s600_s9, %s600_s9  ;;  %p609_p9 = scmp.lt.u32.totalorder %s600_s9, %s1017_s1 }
  0x1e   : > { %p603_p7 = pnand %p602_p5, %p601_p3 }
  0x1f   : > { %p610_p10 = por %p609_p9, %p607_p8 }
  0x20   : > { %p604_p4 = pneg %p603_p7 }
  0x22   : > { %p611_p11 = pnand %p610_p10, %p604_p4 }
  0x24   : > { %614 = shalt.err (!%p611_p11)
}
  0x25   : > { %s615_s17 = scalar_lea.vmem %s158_s5, 256  ;;  %s622_s21 = scalar_lea.vmem %s158_s5, 512 }
  0x26   : > { %p616_p1 = scmp.ne.s32.totalorder %s158_s5, %s615_s17  ;;  %p623_p12 = scmp.lt.s32.totalorder %s158_s5, %s158_s5 }
  0x27   : > { %p624_p6 = scmp.lt.s32.totalorder %s622_s21, %s615_s17 }
  0x28   : > { %p618_p13 = pnand %p616_p1, %p602_p5 }
  0x29   : > { %p625_p3 = por %p624_p6, %p623_p12 }
  0x2a   : > { %p619_p0 = pneg %p618_p13 }
  0x2c   : > { %p626_p7 = pnand %p625_p3, %p619_p0 }
  0x2e   : > { %629 = shalt.err (!%p626_p7)
}
  0x2f   : > { %s770_s22 = smov 128   ;;  %s771_s24 = smov 8  }
  0x30   : > { %499 = dma.hbm_to_vmem [thread:$0]  (!%p874_p2), %s1017_s1, 256, %s158_s5, [#allocation6], %s770_s22, %s770_s22, %s771_s24  }
  0x31   : > { %p475_p13 = scmp.ge.s32.totalorder %s767_s0, 1  ;;  %p189_p4 = scmp.lt.s32.totalorder %s767_s0, 3 }
  0x32   : > { %s772_s7 = smov [#allocation8]   ;;  %s630_s11 = scalar_lea.hbm %s1018_s2, 256 }
  0x33   : > { %p905_p8 = pnand %p475_p13, %p189_p4  ;;  %s181_s8 = sshll.u32 %s772_s7, 4  ;;  %s182_s8 = int_to_ptr.vmem [resolvable:$true] %s181_s8 }
  0x34   : > { %p631_p6 = scmp.ne.s32.totalorder %s1018_s2, %s630_s11  ;;  %p637_p9 = scmp.lt.u32.totalorder %s630_s11, %s630_s11 }
  0x35   : > { %s1027_s4 = scalar_select %p905_p8, 1, 0 }
  0x36   : > { %p633_p12 = pnand %p631_p6, %p602_p5  ;;  %p639_p10 = scmp.lt.u32.totalorder %s630_s11, %s1018_s2 }
  0x38   : > { %p634_p0 = pneg %p633_p12  ;;  %p640_p11 = por %p639_p10, %p637_p9 }
  0x3a   : > { %p641_p1 = pnand %p640_p11, %p634_p0 }
  0x3c   : > { %644 = shalt.err (!%p641_p1)
}
  0x3d   : > { %s645_s21 = scalar_lea.vmem %s182_s8, 256  ;;  %s652_s26 = scalar_lea.vmem %s182_s8, 512 }
  0x3e   : > { %p646_p3 = scmp.ne.s32.totalorder %s182_s8, %s645_s21  ;;  %p653_p4 = scmp.lt.s32.totalorder %s182_s8, %s182_s8 }
  0x3f   : > { %p654_p8 = scmp.lt.s32.totalorder %s652_s26, %s645_s21 }
  0x40   : > { %p648_p7 = pnand %p646_p3, %p602_p5 }
  0x41   : > { %p655_p6 = por %p654_p8, %p653_p4 }
  0x42   : > { %p649_p13 = pneg %p648_p7 }
  0x44   : > { %p656_p12 = pnand %p655_p6, %p649_p13 }
  0x46   : > { %659 = shalt.err (!%p656_p12)
}
  0x47   : > { %502 = dma.hbm_to_vmem [thread:$0]  (!%p874_p2), %s1018_s2, 256, %s182_s8, [#allocation9], %s770_s22, %s770_s22, %s771_s24  }
  0x48   : > { %p1028_p0 = scmp.ne.s32.totalorder %s1027_s4, 0 }
  0x49   : > { %s195_s9 = sand.u32 (!%p1028_p0), 1, %s755_s18   ;;  %p1029_p5 = scmp.ne.s32.totalorder (!%p1028_p0), %s1023_s25, 0 }
  0x4a   : > { %193 = sbr.rel (%p1028_p0) target bundleno = 190 (0xbe), region = 28  ;;  %s476_s10 = sshll.u32 (!%p1028_p0), %s195_s9, 4 }
  0x4b   : > { %s196_s11 = scalar_lea.sflag (!%p1028_p0), [#allocation6], %s195_s9  ;;  %s199_s12 = scalar_lea.vmem (!%p1028_p0), [#allocation5], %s476_s10 }
  0x51   : > { %725 = dma.done.wait (%p1029_p5), %s196_s11, 256  }
  0x52   : > { %727 = vsyncadd (%p1029_p5), %s196_s11, 4294967040  ;;  %s205_s6 = scalar_lea.sflag [#allocation9], %s195_s9  ;;  %s939_s13 = scalar_lea.vmem [#allocation8], %s476_s10 }
  0x53   : > { %729 = dma.done.wait (%p1029_p5), %s205_s6, 256  }
  0x54   : > { %731 = vsyncadd (%p1029_p5), %s205_s6, 4294967040  ;;  %s231_s22 = sand.u32 1, %s743_s15   ;;  %s312_s24 = sld [smem:[#allocation4]]  ;;  %v773_v0 = vmov 0.0   ;;  %v247_v1 = vld [vmem:[%s199_s12] sm:$0xff]  ;;  %v248_v2 = vld [vmem:[%s199_s12 + $0x8] sm:$0xff] }
  0x55   : > { %s948_s4 = sshll.u32 %s231_s22, 3  ;;  %246 = vst [vmem:[#allocation2] sm:$0xff] %v773_v0  ;;  %s481_s8 = sshll.u32 %s759_s19, 11  ;;  %v251_v3 = vand.u32 2147483647, %v247_v1  ;;  %vm291_vm0 = vcmp.ge.f32.partialorder %v247_v1, 0.0 }
  0x56   : > { %v252_v4 = vand.u32 2147483647, %v248_v2  ;;  %v249_v15 = vld [vmem:[%s939_s13] sm:$0xff]  ;;  %vm292_vm1 = vcmp.ge.f32.partialorder %v248_v2, 0.0  ;;  %v250_v17 = vld [vmem:[%s939_s13 + $0x8] sm:$0xff]  ;;  %v259_v37 = vmax.f32 %v247_v1, 0.0 }
  0x57   : > { %v253_v5 = vsub.f32 0.0, %v251_v3  ;;  %v261_v38 = vmul.f32 %v249_v15, %v247_v1  ;;  %v260_v39 = vmax.f32 %v248_v2, 0.0  ;;  %v262_v40 = vmul.f32 %v250_v17, %v248_v2  ;;  %s233_s25 = scalar_lea.vmem [#allocation10], %s948_s4 }
  0x58   : > { %v254_v6 = vsub.f32 0.0, %v252_v4 }
  0x59   : > { %v255_v7 = vmul.f32 1.442695, %v253_v5  ;;  %v263_v45 = vsub.f32 %v259_v37, %v261_v38  ;;  %v264_v46 = vsub.f32 %v260_v39, %v262_v40 }
  0x5a   : > { %s951_s5 = ssub.s32 %s312_s24, %s481_s8  ;;  %v257_v8 = vmul.f32 1.442695, %v254_v6 }
  0x5b   : > { %584 = vpow2.f32 %v255_v7  ;;  %p482_p2 = scmp.lt.s32.totalorder %s951_s5, 2048 }
  0x5c   : > { %586 = vpow2.f32 %v257_v8  ;;  %v319_v57 = vld [vmem:[#allocation2] sm:$0xff] (!%p482_p2) }
  0x65   : > { %v585_v9 = vpop.eup %584 }
  0x66   : > { %v587_v10 = vpop.eup %586  ;;  %v265_v11 = vadd.f32 1.0, %v585_v9  ;;  %v268_v23 = vmul.f32 -0.5, %v585_v9  ;;  %v271_v32 = vand.u32 2147483647, %v585_v9 }
  0x67   : > { %v274_v12 = vadd.f32 1.0, %v587_v10  ;;  %v277_v25 = vmul.f32 -0.5, %v587_v10  ;;  %v280_v36 = vand.u32 2147483647, %v587_v10 }
  0x68   : > { %588 = vrcp.f32 %v265_v11  ;;  %v269_v29 = vadd.f32 1.0, %v268_v23  ;;  %vm272_vm2 = vcmp.lt.f32.partialorder %v271_v32, 0.0004427343 }
  0x69   : > { %590 = vrcp.f32 %v274_v12  ;;  %v278_v33 = vadd.f32 1.0, %v277_v25  ;;  %vm281_vm3 = vcmp.lt.f32.partialorder %v280_v36, 0.0004427343 }
  0x6a   : > { %592 = vlog2.f32 %v265_v11  ;;  %v270_v42 = vmul.f32 %v585_v9, %v269_v29 }
  0x6b   : > { %594 = vlog2.f32 %v274_v12  ;;  %v279_v44 = vmul.f32 %v587_v10, %v278_v33 }
  0x72   : > { %v589_v13 = vpop.eup %588 }
  0x73   : > { %v591_v14 = vpop.eup %590  ;;  %v293_v16 = vmul.f32 %v589_v13, %v585_v9 }
  0x74   : > { %v294_v18 = vmul.f32 %v591_v14, %v587_v10  ;;  %v593_v31 = vpop.eup %592 }
  0x75   : > { %v295_v19 = vsel %vm291_vm0, %v589_v13, %v293_v16  ;;  %v595_v35 = vpop.eup %594  ;;  %v267_v41 = vmul.f32 0.6931472, %v593_v31 }
  0x76   : > { %v296_v20 = vsel %vm292_vm1, %v591_v14, %v294_v18  ;;  %v297_v21 = vsub.f32 %v295_v19, %v249_v15  ;;  %v276_v43 = vmul.f32 0.6931472, %v595_v35 }
  0x77   : > { %v298_v22 = vsub.f32 %v296_v20, %v250_v17  ;;  %v273_v47 = vsel %vm272_vm2, %v270_v42, %v267_v41 }
  0x78   : > { %v479_v24 = vadd.f32 -1.0, %v297_v21  ;;  %v282_v48 = vsel %vm281_vm3, %v279_v44, %v276_v43  ;;  %v283_v49 = vadd.f32 %v273_v47, %v263_v45 }
  0x79   : > { %v480_v26 = vadd.f32 -1.0, %v298_v22  ;;  %v284_v51 = vadd.f32 %v282_v48, %v264_v46 }
  0x7a   : > { %v301_v27 = vmul.f32 19.96008, %v479_v24 }
  0x7b   : > { %v302_v28 = vmul.f32 19.96008, %v480_v26 }
  0x7c   : > { %v303_v30 = vmul.f32 1.442695, %v301_v27 }
  0x7d   : > { %v305_v34 = vmul.f32 1.442695, %v302_v28 }
  0x7e   : > { %596 = vpow2.f32 %v303_v30 }
  0x7f   : > { %598 = vpow2.f32 %v305_v34 }
  0x86   : > { %318 = sbr.rel (%p482_p2) target bundleno = 147 (0x93), region = 44 }
  0x88   : > { %v597_v50 = vpop.eup %596 }
  0x89   : > { %v599_v52 = vpop.eup %598  ;;  %v307_v53 = vsub.f32 1.0, %v597_v50 }
  0x8a   : > { %v308_v54 = vsub.f32 1.0, %v599_v52 }
  0x8b   : > { %v309_v55 = vmul.f32 %v307_v53, %v283_v49 }
  0x8c   : > { %v310_v56 = vmul.f32 %v308_v54, %v284_v51 }
  0x8e   : > { %v320_v58 = vadd.f32 %v310_v56, %v309_v55 }
  0x90   : > { %v321_v59 = vadd.f32 %v320_v58, %v319_v57 }
  0x92   : > { %322 = vst [vmem:[#allocation2] sm:$0xff] %v321_v59 }
  0x93 PF: > { %p483_p8 = scmp.ge.s32.totalorder %s951_s5, 2048 }
  0x94   : > { %v327_v60 = vlaneseq (!%p483_p8)  ;;  %v336_v1 = vstv (!%p483_p8), %s951_s5 }
  0x95   : > { %326 = sbr.rel (%p483_p8) target bundleno = 165 (0xa5), region = 48 }
  0x96   : > { %v328_v61 = vshrl.u32 (!%p483_p8), %v327_v60, 7  ;;  %v331_v62 = vand.u32 (!%p483_p8), 127, %v327_v60 }
  0x98   : > { %v329_v63 = vadd.s32 (!%p483_p8), 8, %v328_v61  ;;  %v332_v0 = vmul.u32 (!%p483_p8), 128, %v328_v61 }
  0x99   : > { %v341_v7 = vld [vmem:[#allocation2] sm:$0xff] (!%p483_p8) }
  0x9a   : > { %v333_v2 = vmul.u32 (!%p483_p8), 128, %v329_v63  ;;  %v334_v3 = vadd.s32 (!%p483_p8), %v332_v0, %v331_v62 }
  0x9c   : > { %v335_v4 = vadd.s32 %v333_v2, %v331_v62  ;;  %vm337_vm4 = vcmp.lt.s32.totalorder %v334_v3, %v336_v1 }
  0x9d   : > { %v339_v5 = vsel %vm337_vm4, %v309_v55, 0.0 }
  0x9e   : > { %vm338_vm5 = vcmp.lt.s32.totalorder %v335_v4, %v336_v1 }
  0x9f   : > { %v340_v6 = vsel %vm338_vm5, %v310_v56, 0.0 }
  0xa0   : > { %v342_v8 = vadd.f32 %v340_v6, %v339_v5 }
  0xa2   : > { %v343_v9 = vadd.f32 %v342_v8, %v341_v7 }
  0xa4   : > { %344 = vst [vmem:[#allocation2] sm:$0xff] %v343_v9 }
  0xa5 PF: > { %s485_s17 = sshll.u32 %s759_s19, 7  ;;  %s364_s7 = sshll.u32 %s233_s25, 4  ;;  %s365_s7 = int_to_ptr.vmem [resolvable:$true] %s364_s7 }
  0xa6   : > { %s965_s27 = scalar_lea.hbm %s1019_s3, %s485_s17  ;;  %s351_s9 = scalar_lea.sflag [#allocation7], %s231_s22 }
  0xa7   : > { %s660_s10 = scalar_lea.vmem %s365_s7, 128  ;;  %p1030_p10 = scmp.ne.s32.totalorder %s1024_s29, 0 }
  0xa8   : > { %p661_p9 = scmp.ne.s32.totalorder %s365_s7, %s660_s10  ;;  %s774_s11 = smov [#allocation10]  }
  0xa9   : > { %s664_s12 = sshll.u32 %s774_s11, 4  ;;  %s665_s12 = int_to_ptr.vmem [resolvable:$false] %s664_s12 }
  0xaa   : > { %p662_p11 = pnand %p661_p9, %p1030_p10  ;;  %s666_s19 = scalar_lea.vmem %s665_s12, 256 }
  0xab   : > { %v348_v10 = vld [vmem:[#allocation2] sm:$0xff]  ;;  %p667_p3 = scmp.lt.s32.totalorder %s365_s7, %s665_s12  ;;  %p668_p7 = scmp.lt.s32.totalorder %s666_s19, %s660_s10 }
  0xac   : > { %349 = vst [vmem:[%s233_s25] sm:$0xff] %v348_v10  ;;  %p663_p1 = pneg %p662_p11 }
  0xad   : > { %p669_p13 = por %p668_p7, %p667_p3 }
  0xaf   : > { %p670_p4 = pnand %p669_p13, %p663_p1 }
  0xb1   : > { %673 = shalt.err (!%p670_p4)
}
  0xb2   : > { %s674_s6 = scalar_lea.hbm %s965_s27, 128  ;;  %s678_s24 = scalar_lea.hbm %s1019_s3, 256 }
  0xb3   : > { %p675_p6 = scmp.ne.s32.totalorder %s965_s27, %s674_s6  ;;  %p679_p5 = scmp.lt.u32.totalorder %s965_s27, %s1019_s3 }
  0xb4   : > { %p680_p2 = scmp.lt.u32.totalorder %s678_s24, %s674_s6  ;;  %p682_p9 = scmp.lt.u32.totalorder %s674_s6, %s965_s27 }
  0xb5   : > { %p676_p12 = pnand %p675_p6, %p1030_p10 }
  0xb6   : > { %p681_p8 = por %p680_p2, %p679_p5 }
  0xb7   : > { %p677_p0 = pneg %p676_p12 }
  0xb8   : > { %p683_p11 = por %p682_p9, %p681_p8 }
  0xba   : > { %p684_p1 = pnand %p683_p11, %p677_p0 }
  0xbc   : > { %687 = shalt.err (!%p684_p1)
}
  0xbd   : > { %494 = dma.vmem_to_hbm [thread:$0]  (%p1030_p10), %s365_s7, 128, %s965_s27, %s351_s9  }
  0xbe PF: > { %s376_s5 = sand.u32 1, %s739_s14   ;;  %p1031_p3 = scmp.ne.s32.totalorder %s1025_s30, 0 }
  0xbf   : > { %p1032_p7 = scmp.ge.s32.totalorder %s767_s0, 2  ;;  %s377_s25 = scalar_lea.sflag [#allocation7], %s376_s5 }
  0xc1   : > { %p504_p13 = pnand %p1032_p7, %p1031_p3 }
  0xc3   : > { %733 = dma.done.wait (!%p504_p13), %s377_s25, 128  }
  0xc4   : > { %735 = vsyncadd (!%p504_p13), %s377_s25, 4294967168  ;;  %s23_s0 = sadd.s32 1, %s767_s0   ;;  %s1033_s14 = smov %s743_s15 }
  0xc5   : > { %p20_p4 = scmp.ge.s32.totalorder %s23_s0, 4   ;;  %s1034_s15 = smov %s747_s16 }
  0xc6   : > { %s1035_s16 = smov %s856_s28  ;;  %s1036_s17 = smov %s755_s18 }
  0xc7   : > { %s1006_s18 = smov 0   ;;  %s1037_s19 = smov %s763_s20 }
  0xc8   : > { %s1038_s20 = smov %s1040_s23  ;;  %22 = sbr.rel (!%p20_p4) target bundleno = 11 (0xb), region = 102 }
  0xcf   :  { %382 = vsyncpa [#allocation6], 1 }
  0xd0   :  { %384 = vsyncpa [#allocation6 + $0x1], 1 }
  0xd1   :  { %385 = vsyncpa [#allocation9], 1 }
  0xd2   :  { %387 = vsyncpa [#allocation9 + $0x1], 1 }
  0xd3   :  { %388 = vsyncpa [#allocation7], 1 }
  0xd4   :  { %390 = vsyncpa [#allocation7 + $0x1], 1 }

</bundles_post_ra>
